<compile_context>
chip_gen: v7x
topology: tpu7x:2x2x1
jax: 0.10.0
libtpu: 0.0.40
codegen_flags: <defaults>
</compile_context>

<pallas_src>
import jax
import jax.numpy as jnp
from jax.experimental import pallas as pl
from jax.experimental.pallas import tpu as pltpu


def _round_up(n, m):
    return ((n + m - 1) // m) * m


def _sublane_multiple(dtype):
    # Sub-32-bit dtypes pack along sublanes: 8 rows for f32, 16 for bf16, 32 for int8.
    return 8 * max(1, 4 // jnp.dtype(dtype).itemsize)


def _vmem_capacity_bytes():
    try:
        cap = getattr(pltpu.get_tpu_info(), "vmem_capacity_bytes", None)
        if cap:
            return int(cap)
    except Exception:
        pass
    return 64 * 1024 * 1024  # conservative (v7x-sized) default


def _resident_spec(block_shape, index_map):
    """Spec for a block whose index_map is constant across the grid (stays resident).

    Single-buffer it when the running Pallas version supports pipeline_mode; the block
    is only fetched once, so no pipelining is lost and its VMEM footprint is halved.
    """
    buffered = getattr(pl, "Buffered", None)
    if buffered is not None:
        try:
            return pl.BlockSpec(block_shape, index_map, pipeline_mode=buffered(1))
        except Exception:
            pass
    return pl.BlockSpec(block_shape, index_map)


# -----------------------------------------------------------------------------
# Kernel 1: learned 4->1 downsample, (tg, 4C) @ (4C, C) on the MXU (f32 accum).
# -----------------------------------------------------------------------------
def _downsample_matmul_kernel(xp_ref, w_ref, out_ref):
    out_ref[...] = jnp.dot(
        xp_ref[...], w_ref[...], preferred_element_type=jnp.float32
    ).astype(out_ref.dtype)


# -----------------------------------------------------------------------------
# Kernel 2: fused prefix copy + ordered leaf / non-leaf scatter as a row gather.
#   out[r] = x[gidx[r]]              if gidx[r] <  x_rows   (prefix + leaf rows)
#            pooled[gidx[r]-x_rows]  otherwise              (learned-downsample rows)
# Whole-tile vector gather: no per-row scalar loop, full (tm, C) stores.
# -----------------------------------------------------------------------------
def _gather_rows_kernel(idx_ref, x_ref, pool_ref, out_ref):
    n_x = x_ref.shape[0]
    idx = idx_ref[...]                                           # (tm, 1) int32
    from_x = idx < n_x                                           # (tm, 1) bool
    iv = idx[:, 0]                                               # (tm,)
    xi = jnp.where(iv < n_x, iv, 0)
    pi = jnp.where(iv < n_x, 0, iv - n_x)
    x_rows = jnp.take(x_ref[...], xi, axis=0, mode="clip")       # (tm, C)
    p_rows = jnp.take(pool_ref[...], pi, axis=0, mode="clip")    # (tm, C)
    out_ref[...] = jnp.where(from_x, x_rows, p_rows).astype(out_ref.dtype)


def _gather_rows_fallback_kernel(gidx_ref, x_ref, pool_ref, out_ref):
    """Fallback if the vector-gather lowering is unavailable: build (8, C) sublane
    groups from 8 dynamically addressed single-row loads (SMEM-indexed), with one
    full-sublane store per group."""
    i = pl.program_id(0)
    tm = out_ref.shape[0]          # static block shape
    n_x = x_ref.shape[0]

    def group(g, carry):
        rows = []
        for r in range(8):                                       # static, unrolled
            j = gidx_ref[i * tm + g * 8 + r]                     # SMEM scalar read
            use_x = j < n_x
            xi = jnp.where(use_x, j, 0)
            pi = jnp.where(use_x, 0, j - n_x)
            xr = x_ref[pl.ds(xi, 1), :]
            pr = pool_ref[pl.ds(pi, 1), :]
            rows.append(jnp.where(use_x, xr, pr))
        tile = jnp.concatenate(rows, axis=0).astype(out_ref.dtype)
        out_ref[pl.ds(pl.multiple_of(g * 8, 8), 8), :] = tile
        return carry

    jax.lax.fori_loop(0, tm // 8, group, 0, unroll=True)


def graph_downsample(x, weights, leaf_mask, numd, lnumd):
    """Pallas implementation of GraphDownsample.forward (channels_in == channels_out).

    x:         (N, C) node features (float32)
    weights:   (C, C, 4) Downsample parameter
    leaf_mask: (M,) bool with M == lnumd + numd // 4 and exactly lnumd True entries
    numd, lnumd: static python ints
    """
    N, C = x.shape
    assert numd % 4 == 0, "numd must be divisible by 4"
    ng = numd // 4
    prefix = N - numd - lnumd
    assert prefix >= 0
    M = lnumd + ng
    assert leaf_mask.shape[0] == M, "leaf_mask length must equal lnumd + numd//4"
    dtype = x.dtype

    # Degenerate size: PyTorch's negative-zero slicing is ill defined for numd == 0.
    if ng == 0:
        return x

    sub = _sublane_multiple(dtype)
    vmem_cap = _vmem_capacity_bytes()
    row_tile_cap = 1024 if vmem_cap >= 96 * 1024 * 1024 else 512
    cparams = pltpu.CompilerParams(
        dimension_semantics=("parallel",),          # independent row tiles
        vmem_limit_bytes=int(vmem_cap * 3 // 4),    # ~48 MiB (v7x) / ~96 MiB (v5e/v6e)
    )

    # ---- kernel 1: learned 4->1 downsample of the deepest-level nodes -------
    w2 = weights.reshape(C, 4 * C).T                # (4C, C) == weights.flatten(1).t()
    pool_packed = x[N - numd:].reshape(ng, 4 * C)   # contiguous rows -> lane packing
    tg = max(sub, min(row_tile_cap, _round_up(ng, sub)))
    pooled = pl.pallas_call(
        _downsample_matmul_kernel,
        out_shape=jax.ShapeDtypeStruct((ng, C), dtype),
        grid=(pl.cdiv(ng, tg),),
        in_specs=[
            pl.BlockSpec((tg, 4 * C), lambda i: (i, 0)),
            pl.BlockSpec((4 * C, C), lambda i: (0, 0)),   # small resident weight block
        ],
        out_specs=pl.BlockSpec((tg, C), lambda i: (i, 0)),
        compiler_params=cparams,
    )(pool_packed, w2)

    # ---- kernel 2: single fused pass writes the whole output ----------------
    # Row-source index: gidx[r] < N  -> row comes from x, else from pooled[gidx[r]-N].
    lm = leaf_mask.astype(jnp.int32)
    leaf_pos = jnp.cumsum(lm) - 1                   # k-th True  -> leaf row k (x row prefix+k)
    pool_pos = jnp.cumsum(1 - lm) - 1               # j-th False -> pooled row j
    mixed_idx = jnp.where(leaf_mask, prefix + leaf_pos, N + pool_pos)
    gidx = jnp.concatenate(
        [jnp.arange(prefix, dtype=jnp.int32), mixed_idx.astype(jnp.int32)])

    T = prefix + M                                  # total output rows
    tm = max(sub, min(row_tile_cap, _round_up(T, sub)))
    n_tiles = pl.cdiv(T, tm)
    gidx = jnp.pad(gidx, (0, n_tiles * tm - T))     # static trip count; index 0 is valid

    # TODO(synk): both gather sources stay resident in VMEM; for very large N*C add an
    # HBM-resident (memory_space=pl.ANY) DMA-gather path to stay under the v7x 64 MiB budget.
    # TODO(synk): for C < 128 the output stores are lane-sparse (vst.msk); a production
    # path should pack 128//C rows per vreg row or use C >= 128.
    try:
        out = pl.pallas_call(
            _gather_rows_kernel,
            out_shape=jax.ShapeDtypeStruct((T, C), dtype),
            grid=(n_tiles,),
            in_specs=[
                pl.BlockSpec((tm, 1), lambda i: (i, 0)),      # per-tile index vector
                _resident_spec((N, C), lambda i: (0, 0)),     # x, fetched once
                _resident_spec((ng, C), lambda i: (0, 0)),    # pooled, fetched once
            ],
            out_specs=pl.BlockSpec((tm, C), lambda i: (i, 0)),
            compiler_params=cparams,
        )(gidx.reshape(n_tiles * tm, 1), x, pooled)
    except Exception:
        # Vector-gather lowering unavailable: batched dynamic-row loads driven by
        # scalar-prefetched (SMEM) indices, 8 rows per full-sublane store.
        out = pl.pallas_call(
            _gather_rows_fallback_kernel,
            out_shape=jax.ShapeDtypeStruct((T, C), dtype),
            grid_spec=pltpu.PrefetchScalarGridSpec(
                num_scalar_prefetch=1,
                grid=(n_tiles,),
                in_specs=[
                    pl.BlockSpec((N, C), lambda i, g: (0, 0)),
                    pl.BlockSpec((ng, C), lambda i, g: (0, 0)),
                ],
                out_specs=pl.BlockSpec((tm, C), lambda i, g: (i, 0)),
            ),
            compiler_params=cparams,
        )(gidx, x, pooled)

    # TODO(synk): Conv1x1BnGelu branch (only when channels_in != channels_out) is not
    # implemented; the module default (channels_out=None) never constructs it.
    return out


def _reference(x, weights, leaf_mask, numd, lnumd):
    """Pure-JAX mirror of the PyTorch forward (for the correctness check)."""
    N, C = x.shape
    w2 = weights.reshape(C, 4 * C).T
    outd = x[N - numd:].reshape(-1, 4 * C) @ w2
    M = leaf_mask.shape[0]
    out = jnp.zeros((M, C), x.dtype)
    leaf_idx = jnp.nonzero(leaf_mask)[0]
    non_idx = jnp.nonzero(jnp.logical_not(leaf_mask))[0]
    out = out.at[leaf_idx].set(x[N - lnumd - numd:N - numd])
    out = out.at[non_idx].set(outd)
    return jnp.concatenate([x[:N - numd - lnumd], out], axis=0)


if __name__ == "__main__":
    key = jax.random.PRNGKey(0)
    C = 32
    numd = 16        # deepest-level node count, divisible by 4
    lnumd = 8        # leaf node count at the coarser level
    prefix = 8       # untouched shallower nodes
    ng = numd // 4
    M = lnumd + ng
    N = prefix + lnumd + numd

    kx, kw, km = jax.random.split(key, 3)
    x = jax.random.normal(kx, (N, C), dtype=jnp.float32)
    weights = 0.1 * jax.random.normal(kw, (C, C, 4), dtype=jnp.float32)
    # Deterministic leaf mask with exactly lnumd True entries (module precondition).
    perm = jax.random.permutation(km, M)
    leaf_mask = jnp.zeros((M,), dtype=jnp.bool_).at[perm[:lnumd]].set(True)
    assert int(leaf_mask.sum()) == lnumd, "leaf_mask must have exactly lnumd True entries"

    out = graph_downsample(x, weights, leaf_mask, numd, lnumd)
    out = jax.block_until_ready(out)

    ref = _reference(x, weights, leaf_mask, numd, lnumd)
    assert out.shape == ref.shape, (out.shape, ref.shape)
    assert jnp.allclose(out, ref, atol=1e-3, rtol=1e-3), "mismatch vs reference"
    print("KERNEL_OK")
</pallas_src>

<mosaic_0001>
module attributes {stable_mosaic.version = 11 : i64} {
  func.func @_downsample_matmul_kernel(%arg0: i32, %arg1: memref<8x128xf32, #tpu.memory_space<vmem>>, %arg2: memref<128x32xf32, #tpu.memory_space<vmem>>, %arg3: memref<8x32xf32, #tpu.memory_space<vmem>>) attributes {dimension_semantics = [#tpu.dimension_semantics<parallel>], iteration_bounds = array<i64: 1>, scalar_prefetch = 0 : i64, scratch_operands = 0 : i64, tpu.core_type = #tpu.core_type<tc>, window_params = [{transform_indices = @transform_0, window_bounds = array<i64: 8, 128>}, {pipeline_mode = #tpu.pipeline_mode<synchronous>, transform_indices = @transform_1, window_bounds = array<i64: 128, 32>}, {transform_indices = @transform_2, window_bounds = array<i64: 8, 32>}]} {
    %c0 = arith.constant 0 : index
    %c0_0 = arith.constant 0 : index
    %0 = vector.load %arg1[%c0, %c0_0] : memref<8x128xf32, #tpu.memory_space<vmem>>, vector<8x128xf32>
    %c0_1 = arith.constant 0 : index
    %c0_2 = arith.constant 0 : index
    %1 = vector.load %arg2[%c0_1, %c0_2] : memref<128x32xf32, #tpu.memory_space<vmem>>, vector<128x32xf32>
    %cst = arith.constant dense<0.000000e+00> : vector<8x32xf32>
    %2 = tpu.matmul %0, %1, %cst {dimension_numbers = #tpu.dot_dimension_numbers<[1], [0], [0], [1], [0, 0, 1, 1], [], []>} : vector<8x128xf32>, vector<128x32xf32>, vector<8x32xf32> -> vector<8x32xf32>
    %c0_3 = arith.constant 0 : index
    %c0_4 = arith.constant 0 : index
    %3 = vector.load %arg3[%c0_3, %c0_4] : memref<8x32xf32, #tpu.memory_space<vmem>>, vector<8x32xf32>
    tpu.vector_store %arg3[%c0_3, %c0_4], %2 {strides = array<i32>} : memref<8x32xf32, #tpu.memory_space<vmem>>, vector<8x32xf32>,
    return
  }
  func.func @transform_0(%arg0: i32) -> (i32, i32) {
    %c0_i32 = arith.constant 0 : i32
    %c0_i32_0 = arith.constant 0 : i32
    return %arg0, %c0_i32 : i32, i32
  }
  func.func @transform_1(%arg0: i32) -> (i32, i32) {
    %c0_i32 = arith.constant 0 : i32
    %c0_i32_0 = arith.constant 0 : i32
    %c0_i32_1 = arith.constant 0 : i32
    return %c0_i32, %c0_i32_0 : i32, i32
  }
  func.func @transform_2(%arg0: i32) -> (i32, i32) {
    %c0_i32 = arith.constant 0 : i32
    %c0_i32_0 = arith.constant 0 : i32
    return %arg0, %c0_i32 : i32, i32
  }
}

</mosaic_0001>

<bundles_post_ra>
// kernel: tpu_custom_call.1
= control target key start
LH: loop header
LB: loop body
LE: loop exit
PB: predicated region body
PF: predicated region fallthrough
CT: control target
= control target key end

     0   :  { %7 = vsyncpa [#allocation3], 0  ;;  %v223_v2 = vmov 0.0|0.0   ;;  %vm224_vm0 = vmmov 0   ;;  %v225_v6 = vmov 0.0   ;;  %vm99_vm1 = vcmask 261120   ;;  %s307_s0 = inlined_call_operand.vmem [shape: f32[4,128], index: 0, kind: input, shape index: {}]   ;;  %s308_s1 = inlined_call_operand.vmem [shape: f32[128,32], index: 1, kind: input, shape index: {}]   ;;  %s309_s2 = inlined_call_operand.hbm [shape: f32[4,32], index: 2, kind: output, shape index: {}]  }
   0x1   :  { %v13_v0 = vld [vmem:[%s308_s1] sm:$0xff]  ;;  %v14_v1 = vld [vmem:[%s308_s1 + $0x8] sm:$0xff]  ;;  %169 = vmatprep.subr.bf16.mxu0 %v223_v2  ;;  %v15_v4 = vld [vmem:[%s308_s1 + $0x10] sm:$0xff]  ;;  %166 = vmatprep.mubr.msk.f32.mxu0 %vm224_vm0, %v225_v6 }
   0x2   :  { %v170_v3 = vpack.c.bf16 %v14_v1, %v13_v0  ;;  %v16_v5 = vld [vmem:[%s308_s1 + $0x18] sm:$0xff]  ;;  %v17_v8 = vld [vmem:[%s308_s1 + $0x20] sm:$0xff]  ;;  %v18_v9 = vld [vmem:[%s308_s1 + $0x28] sm:$0xff] }
   0x3   :  { %v173_v7 = vpack.c.bf16 %v16_v5, %v15_v4  ;;  %v176_v10 = vpack.c.bf16 %v18_v9, %v17_v8  ;;  %v19_v11 = vld [vmem:[%s308_s1 + $0x30] sm:$0xff]  ;;  %v20_v12 = vld [vmem:[%s308_s1 + $0x38] sm:$0xff]  ;;  %v21_v14 = vld [vmem:[%s308_s1 + $0x40] sm:$0xff] }
   0x4   :  { %171 = vmatpush3.bf16.msra.mxu0 %v170_v3  ;;  %v179_v13 = vpack.c.bf16 %v20_v12, %v19_v11  ;;  %v22_v15 = vld [vmem:[%s308_s1 + $0x48] sm:$0xff]  ;;  %v23_v17 = vld [vmem:[%s308_s1 + $0x50] sm:$0xff]  ;;  %v24_v18 = vld [vmem:[%s308_s1 + $0x58] sm:$0xff] }
   0x5   :  { %172 = vmatprep.subr.bf16.mxu0 %v223_v2  ;;  %v182_v16 = vpack.c.bf16 %v22_v15, %v21_v14  ;;  %v185_v19 = vpack.c.bf16 %v24_v18, %v23_v17  ;;  %v25_v20 = vld [vmem:[%s308_s1 + $0x60] sm:$0xff]  ;;  %v26_v21 = vld [vmem:[%s308_s1 + $0x68] sm:$0xff]  ;;  %v27_v23 = vld [vmem:[%s308_s1 + $0x70] sm:$0xff] }
   0x6   :  { %v188_v22 = vpack.c.bf16 %v26_v21, %v25_v20  ;;  %v28_v24 = vld [vmem:[%s308_s1 + $0x78] sm:$0xff]  ;;  %v12_v26 = vld [vmem:[%s307_s0] sm:$0xff] }
   0x7   :  { %v191_v25 = vpack.c.bf16 %v28_v24, %v27_v23 }
   0x8   :  { %174 = vmatpush3.bf16.msra.mxu0 %v173_v7 }
   0x9   :  { %175 = vmatprep.subr.bf16.mxu0 %v223_v2 }
   0xc   :  { %177 = vmatpush3.bf16.msra.mxu0 %v176_v10 }
   0xd   :  { %178 = vmatprep.subr.bf16.mxu0 %v223_v2 }
  0x10   :  { %180 = vmatpush3.bf16.msra.mxu0 %v179_v13 }
  0x11   :  { %181 = vmatprep.subr.bf16.mxu0 %v223_v2 }
  0x14   :  { %183 = vmatpush3.bf16.msra.mxu0 %v182_v16 }
  0x15   :  { %184 = vmatprep.subr.bf16.mxu0 %v223_v2 }
  0x18   :  { %186 = vmatpush3.bf16.msra.mxu0 %v185_v19 }
  0x19   :  { %187 = vmatprep.subr.bf16.mxu0 %v223_v2 }
  0x1c   :  { %189 = vmatpush3.bf16.msra.mxu0 %v188_v22 }
  0x1d   :  { %190 = vmatprep.subr.bf16.mxu0 %v223_v2 }
  0x20   :  { %192 = vmatpush3.bf16.msra.mxu0 %v191_v25 }
  0x23   :  { %167 = vmatmul.mubr.f32.vlgmr.msra.gmra.mrb[0].mxu0 %v12_v26 }
  0xf6   :  { %v95_v27 = vpop.f32.mrb[0].mxu0 }
  0xf7   :  { %100 = vst.msk [vmem:[#allocation2] sm:$0xff] %vm99_vm1, %v95_v27  ;;  %v168_v28 = vpop.f32.mrb[1].mxu0 }
  0xf8   :  { %105 = vsyncadd [#allocation3], 64  ;;  %s226_s15 = smov [#allocation2]  }
  0xf9   :  { %s106_s16 = sshll.u32 %s226_s15, 4  ;;  %s107_s16 = int_to_ptr.vmem [resolvable:$true] %s106_s16 }
  0xfa   :  { %s199_s17 = scalar_lea.vmem %s107_s16, 64  ;;  %s203_s1 = scalar_lea.vmem %s107_s16, 128 }
  0xfb   :  { %p200_p0 = scmp.ne.s32.totalorder %s107_s16, %s199_s17  ;;  %p204_p1 = scmp.lt.s32.totalorder %s107_s16, %s107_s16 }
  0xfc   :  { %p205_p2 = scmp.lt.s32.totalorder %s203_s1, %s199_s17 }
  0xfe   :  { %p206_p3 = por %p205_p2, %p204_p1 }
 0x100   :  { %p207_p4 = pnand %p206_p3, %p200_p0 }
 0x102   :  { %210 = shalt.err (!%p207_p4)
}
 0x103   :  { %s211_s0 = scalar_lea.hbm %s309_s2, 64 }
 0x104   :  { %p212_p5 = scmp.ne.s32.totalorder %s309_s2, %s211_s0  ;;  %p215_p6 = scmp.lt.u32.totalorder %s211_s0, %s309_s2 }
 0x106   :  { %p217_p7 = pnand %p215_p6, %p212_p5 }
 0x108   :  { %220 = shalt.err (!%p217_p7)
}
 0x109   :  { %s227_s24 = smov 64   ;;  %s228_s25 = smov 4  }
 0x10a   :  { %112 = dma.vmem_to_hbm [thread:$0]  %s107_s16, 64, %s309_s2, [#allocation3], %s227_s24, %s227_s24, %s228_s25  }
 0x10b   :  { %221 = dma.done.wait [#allocation3], 128  }
 0x10c   :  { %222 = vsyncadd [#allocation3], 4294967168 }
 0x10d   :  { %116 = vsyncpa [#allocation3], 1 }

</bundles_post_ra>
